<compile_context>
chip_gen: v5e
topology: v5e:2x2
jax: 0.10.0
libtpu: 0.0.40
codegen_flags: <defaults>
</compile_context>

<pallas_src>
import math
import functools

import numpy as np
import jax
import jax.numpy as jnp
from jax.experimental import pallas as pl
from jax.experimental.pallas import tpu as pltpu


# --------------------------------------------------------------------------
# Host-side glue: exact numpy port of jaccard_overlap_numpy / match_box
# --------------------------------------------------------------------------
def jaccard_overlap_numpy(box, boxes):
    xy_max = np.minimum(boxes[:, 2:], box[2:])
    xy_min = np.maximum(boxes[:, :2], box[:2])
    inter = np.clip(xy_max - xy_min, a_min=0, a_max=np.inf)
    inter = inter[:, 0] * inter[:, 1]
    area_boxes = (boxes[:, 2] - boxes[:, 0]) * (boxes[:, 3] - boxes[:, 1])
    area_box = (box[2] - box[0]) * (box[3] - box[1])
    iou = inter / (area_box + area_boxes - inter)
    return iou


def match_box(anchors, targets, anchor_mask, h, w, n_classes,
              overlap_thresh=0.5, img_w=416, img_h=416):
    # TODO(synk): data-dependent box matching (argmax / scatter / python loops)
    # has no clean Pallas equivalent; it stays as host-side numpy glue.
    N = len(targets)
    n_anchors = len(anchor_mask)
    p_mask = np.zeros((N, n_anchors, h, w), dtype=np.float32)
    n_mask = np.ones((N, n_anchors, h, w), dtype=np.float32)
    t = np.zeros((N, n_anchors, h, w, n_classes + 5), dtype=np.float32)
    scale = np.zeros((N, n_anchors, h, w), dtype=np.float32)
    anchors = np.hstack((np.zeros((n_anchors, 2)), np.array(anchors)))
    for i in range(len(targets)):
        target = targets[i]
        for j in range(target.shape[0]):
            gw = target[j, 3] * img_w
            gh = target[j, 4] * img_h
            box = np.array([0, 0, gw, gh])
            iou = jaccard_overlap_numpy(box, anchors)
            index = np.argmax(iou)
            if index not in anchor_mask:
                continue
            index = anchor_mask.index(index)
            cx = target[j, 1] * w
            cy = target[j, 2] * h
            gj, gi = (int(cx), int(cy))
            p_mask[i, index, gi, gj] = 1
            n_mask[i, index, gi, gj] = 0
            iou = iou[anchor_mask[i]]
            # torch `n_mask[i, <0-d bool>, gi, gj] = 0`: a 0-d boolean index
            # adds a size-1 dim and consumes none, so the ints hit dims
            # (0, 1, 2) and dim 3 is fully sliced when the bool is True.
            if bool(iou >= overlap_thresh):
                n_mask[i, gi, gj, :] = 0
            t[i, index, gi, gj, 0] = cx - gj
            t[i, index, gi, gj, 1] = cy - gi
            t[i, index, gi, gj, 2] = math.log(gw / anchors[index, 2] + 1e-16)
            t[i, index, gi, gj, 3] = math.log(gh / anchors[index, 3] + 1e-16)
            t[i, index, gi, gj, 4] = 1
            t[i, index, gi, gj, 5 + int(target[j, 0])] = 1
            scale[i, index, gi, gj] = 2 - target[j, 3] * target[j, 4]
        return (p_mask, n_mask, t, scale)


# --------------------------------------------------------------------------
# Pallas kernel: dense confidence loss (per-tile partial sums, parallel grid)
# --------------------------------------------------------------------------
def _conf_sum_kernel(z_ref, w_ref, out_ref):
    """Per-tile partial sum of the confidence loss.

    z_ref  : (8, T)  conf-channel logits (f32)
    w_ref  : (16, T) rows 0-7  = lambda_obj*p_mask + lambda_noobj*n_mask
                     rows 8-15 = lambda_obj*p_mask   (lambdas pre-folded)
    out_ref: (1, 8, 128) per-tile partial sum written to element [0,0,0].
    """
    z = z_ref[...]
    a = w_ref[0:8, :]
    b = w_ref[8:16, :]
    # softplus(z) = max(z,0) + log(1+exp(-|z|))
    #   -log(sigmoid(z))     = softplus(z) - z   (lambda_obj   term, p_mask cells)
    #   -log(1 - sigmoid(z)) = softplus(z)       (lambda_noobj term, n_mask cells)
    sp = jnp.maximum(z, 0.0) + jnp.log(1.0 + jnp.exp(-jnp.abs(z)))
    s = jnp.sum(a * sp - b * z)
    r = jax.lax.broadcasted_iota(jnp.int32, (1, 8, 128), 1)
    c = jax.lax.broadcasted_iota(jnp.int32, (1, 8, 128), 2)
    out_ref[...] = jnp.where((r == 0) & (c == 0), s, 0.0)


def _cdiv(a, b):
    return -(-a // b)


def _round_up(x, m):
    return _cdiv(x, m) * m


@functools.partial(jax.jit, static_argnums=(2, 3))
def _dense_conf_loss(preds, wts, n_classes, tile_l):
    """Conf loss over all pyramid levels with a single pallas_call.

    preds : tuple of (N, A*(n_classes+5), H, W) logits.
    wts   : (16, Lp) f32 host-built weight slab (see _conf_sum_kernel).
    """
    C5 = n_classes + 5
    conf_parts = []
    for p in preds:
        N, C, H, W = p.shape
        A = C // C5
        # Zero-copy reshape; only the conf channel (index 4) is needed densely,
        # so this is an output-sized strided slice, not a full-pred relayout.
        conf = p.reshape(N, A, C5, H * W)[:, :, 4, :]
        conf_parts.append(conf.reshape(-1).astype(jnp.float32))
    conf_flat = jnp.concatenate(conf_parts)

    Lp = wts.shape[1]
    Mp = 8 * Lp
    conf_flat = jnp.pad(conf_flat, (0, Mp - conf_flat.shape[0]))
    conf2d = conf_flat.reshape(8, Lp)

    n_tiles = Lp // tile_l
    partial = pl.pallas_call(
        _conf_sum_kernel,
        out_shape=jax.ShapeDtypeStruct((n_tiles, 8, 128), jnp.float32),
        grid=(n_tiles,),
        in_specs=[
            pl.BlockSpec((8, tile_l), lambda i: (0, i)),
            pl.BlockSpec((16, tile_l), lambda i: (0, i)),
        ],
        out_specs=pl.BlockSpec((1, 8, 128), lambda i: (i, 0, 0)),
        compiler_params=pltpu.CompilerParams(
            dimension_semantics=("parallel",),
            vmem_limit_bytes=32 * 1024 * 1024),
    )(conf2d, wts)
    return jnp.sum(partial)


# --------------------------------------------------------------------------
# Sparse loc / cls losses (only positive cells contribute)
# --------------------------------------------------------------------------
def _sparse_level_loss(pred, pos_idx, t_pos, scale_pos, n_classes,
                       lambda_box, lambda_cls):
    # TODO(synk): O(K) data-dependent gather of positive cells (K known only on
    # the host) is done in plain JAX; a Pallas kernel buys nothing at this size.
    N, C, H, W = pred.shape
    C5 = n_classes + 5
    A = C // C5
    pr = pred.reshape(N, A, C5, H * W)
    ii = jnp.asarray(pos_idx[:, 0])
    aa = jnp.asarray(pos_idx[:, 1])
    hh = jnp.asarray((pos_idx[:, 2] * W + pos_idx[:, 3]).astype(np.int32))
    z = pr[ii, aa, :, hh].astype(jnp.float32)          # (K, C5)
    t = jnp.asarray(t_pos)                              # (K, C5)
    sc = jnp.asarray(scale_pos)                         # (K,)
    sp = jnp.maximum(z, 0.0) + jnp.log(1.0 + jnp.exp(-jnp.abs(z)))
    bce = sp - t * z                                    # BCE(sigmoid(z), t)
    loc = lambda_box * jnp.sum(
        (bce[:, 0] + bce[:, 1]
         + (z[:, 2] - t[:, 2]) ** 2 + (z[:, 3] - t[:, 3]) ** 2) * sc)
    cls = lambda_cls * jnp.sum(bce[:, 5:])
    return loc, cls


# --------------------------------------------------------------------------
# YoloLoss "module"
# --------------------------------------------------------------------------
class YoloLoss:
    def __init__(self, anchors, anchor_masks, n_classes, overlap_thresh=0.45,
                 lambda_obj=1, lambda_noobj=0.5, lambda_cls=1, lambda_box=2.5,
                 img_w=416, img_h=416):
        self.n_classes = n_classes
        self.overlap_thresh = overlap_thresh
        self.anchors = anchors
        self.anchor_masks = anchor_masks
        self.lambda_obj = lambda_obj
        self.lambda_noobj = lambda_noobj
        self.lambda_cls = lambda_cls
        self.lambda_box = lambda_box
        self.img_w = img_w
        self.img_h = img_h

    def forward(self, preds, targets):
        targets_np = [np.asarray(tt, dtype=np.float32) for tt in targets]
        C5 = self.n_classes + 5

        pm_parts, nm_parts, level_pos = [], [], []
        pos_num = 0.0
        for l in range(len(preds)):
            N, _, H, W = preds[l].shape
            # note: (img_h, img_w) passed in the same (swapped) positional
            # order as the original torch forward.
            p_mask, n_mask, t, scale = match_box(
                self.anchors, targets_np, self.anchor_masks[l], H, W,
                self.n_classes, self.overlap_thresh, self.img_h, self.img_w)
            # torch sums the CPU p_mask tensor before moving it to device.
            pos_num += float(np.sum(p_mask))
            pm_parts.append(p_mask.reshape(-1))
            nm_parts.append(n_mask.reshape(-1))
            # Positive cells (dedup + last-write-wins via the dense host masks).
            idx = np.argwhere(p_mask > 0.5).astype(np.int32)
            if idx.shape[0]:
                t_pos = t[idx[:, 0], idx[:, 1], idx[:, 2], idx[:, 3], :]
                s_pos = scale[idx[:, 0], idx[:, 1], idx[:, 2], idx[:, 3]]
            else:
                t_pos = np.zeros((0, C5), np.float32)
                s_pos = np.zeros((0,), np.float32)
            level_pos.append((idx, t_pos.astype(np.float32),
                              s_pos.astype(np.float32)))

        # Dense conf-loss weights: lambdas folded host-side, packed into one
        # sublane-aligned (16, Lp) slab, padded columns are all-zero weight.
        pm = np.concatenate(pm_parts)
        nm = np.concatenate(nm_parts)
        M = pm.shape[0]
        tile_l = min(16384, _round_up(_cdiv(M, 8), 128))
        Lp = _round_up(_cdiv(M, 8), tile_l)
        Mp = 8 * Lp
        a = np.zeros((Mp,), np.float32)
        b = np.zeros((Mp,), np.float32)
        a[:M] = self.lambda_obj * pm + self.lambda_noobj * nm
        b[:M] = self.lambda_obj * pm
        wts = np.concatenate([a.reshape(8, Lp), b.reshape(8, Lp)], axis=0)

        conf_loss = _dense_conf_loss(tuple(preds), jnp.asarray(wts),
                                     self.n_classes, tile_l)

        loc_loss = jnp.zeros((), jnp.float32)
        cls_loss = jnp.zeros((), jnp.float32)
        for l, (idx, t_pos, s_pos) in enumerate(level_pos):
            if idx.shape[0] == 0:
                continue
            loc_l, cls_l = _sparse_level_loss(
                preds[l], idx, t_pos, s_pos, self.n_classes,
                self.lambda_box, self.lambda_cls)
            loc_loss = loc_loss + loc_l
            cls_loss = cls_loss + cls_l
        return (loc_loss, conf_loss, cls_loss, jnp.float32(pos_num))

    __call__ = forward


# --------------------------------------------------------------------------
if __name__ == "__main__":
    key = jax.random.PRNGKey(0)

    n_classes = 3
    anchors = [(10, 13), (30, 61), (62, 45)]        # pixel anchors
    anchor_masks = [[0, 1, 2], [0, 1, 2]]           # one mask per feature level
    loss_fn = YoloLoss(anchors, anchor_masks, n_classes)

    N = 2
    C = (n_classes + 5) * len(anchors)              # 24 channels

    k1, k2, k3 = jax.random.split(key, 3)
    pred0 = jax.random.normal(k1, (N, C, 8, 8), dtype=jnp.float32)
    pred1 = jax.random.normal(k2, (N, C, 16, 16), dtype=jnp.float32)

    # targets: list (one per image) of (n_objects, 5) = [class, cx, cy, w, h]
    targets = []
    tkeys = jax.random.split(k3, N)
    for i in range(N):
        n_obj = 3
        kk1, kk2, kk3 = jax.random.split(tkeys[i], 3)
        cls_id = jax.random.randint(kk1, (n_obj, 1), 0, n_classes).astype(jnp.float32)
        cxy = jax.random.uniform(kk2, (n_obj, 2), minval=0.1, maxval=0.9)
        wh = jax.random.uniform(kk3, (n_obj, 2), minval=0.15, maxval=0.4)
        tgt = jnp.concatenate([cls_id, cxy, wh], axis=1)
        targets.append(np.asarray(tgt, dtype=np.float32))

    loc, conf, cls_l, pos = loss_fn((pred0, pred1), targets)
    jax.block_until_ready((loc, conf, cls_l, pos))
    print("KERNEL_OK")
</pallas_src>

<mosaic_0001>
module attributes {stable_mosaic.version = 11 : i64} {
  func.func @_conf_sum_kernel(%arg0: i32, %arg1: memref<8x256xf32, #tpu.memory_space<vmem>>, %arg2: memref<16x256xf32, #tpu.memory_space<vmem>>, %arg3: memref<1x8x128xf32, #tpu.memory_space<vmem>>) attributes {dimension_semantics = [#tpu.dimension_semantics<parallel>], iteration_bounds = array<i64: 1>, scalar_prefetch = 0 : i64, scratch_operands = 0 : i64, tpu.core_type = #tpu.core_type<tc>, window_params = [{transform_indices = @transform_0, window_bounds = array<i64: 8, 256>}, {transform_indices = @transform_1, window_bounds = array<i64: 16, 256>}, {transform_indices = @transform_2, window_bounds = array<i64: 1, 8, 128>}]} {
    %c0 = arith.constant 0 : index
    %c0_0 = arith.constant 0 : index
    %0 = vector.load %arg1[%c0, %c0_0] : memref<8x256xf32, #tpu.memory_space<vmem>>, vector<8x256xf32>
    %c0_1 = arith.constant 0 : index
    %c0_2 = arith.constant 0 : index
    %1 = vector.load %arg2[%c0_1, %c0_2] : memref<16x256xf32, #tpu.memory_space<vmem>>, vector<8x256xf32>
    %c8 = arith.constant 8 : index
    %c0_3 = arith.constant 0 : index
    %2 = vector.load %arg2[%c8, %c0_3] : memref<16x256xf32, #tpu.memory_space<vmem>>, vector<8x256xf32>
    %cst = arith.constant 0.000000e+00 : f32
    %3 = vector.broadcast %cst : f32 to vector<8x256xf32>
    %4 = arith.maximumf %0, %3 : vector<8x256xf32>
    %5 = math.absf %0 : vector<8x256xf32>
    %cst_4 = arith.constant 0.000000e+00 : f32
    %6 = vector.broadcast %cst_4 : f32 to vector<8x256xf32>
    %7 = arith.subf %6, %5 : vector<8x256xf32>
    %8 = math.exp %7 : vector<8x256xf32>
    %cst_5 = arith.constant 1.000000e+00 : f32
    %9 = vector.broadcast %cst_5 : f32 to vector<8x256xf32>
    %10 = arith.addf %9, %8 : vector<8x256xf32>
    %11 = math.log %10 : vector<8x256xf32>
    %12 = arith.addf %4, %11 : vector<8x256xf32>
    %13 = arith.mulf %1, %12 : vector<8x256xf32>
    %14 = arith.mulf %2, %0 : vector<8x256xf32>
    %15 = arith.subf %13, %14 : vector<8x256xf32>
    %16 = vector.shape_cast %15 : vector<8x256xf32> to vector<1x8x256xf32>
    %cst_6 = arith.constant dense<0.000000e+00> : vector<1xf32>
    %17 = vector.multi_reduction <add>, %16, %cst_6 [1, 2] : vector<1x8x256xf32> to vector<1xf32>
    %18 = vector.shape_cast %17 : vector<1xf32> to vector<1x1x1xf32>
    %19 = vector.extract %18[0, 0, 0] : f32 from vector<1x1x1xf32>
    %20 = tpu.iota {dimensions = array<i32: 1>} : vector<1x8x128xi32>
    %21 = tpu.iota {dimensions = array<i32: 2>} : vector<1x8x128xi32>
    %c0_i32 = arith.constant 0 : i32
    %22 = vector.broadcast %c0_i32 : i32 to vector<1x8x128xi32>
    %23 = arith.cmpi eq, %20, %22 : vector<1x8x128xi32>
    %c0_i32_7 = arith.constant 0 : i32
    %24 = vector.broadcast %c0_i32_7 : i32 to vector<1x8x128xi32>
    %25 = arith.cmpi eq, %21, %24 : vector<1x8x128xi32>
    %26 = arith.andi %23, %25 : vector<1x8x128xi1>
    %cst_8 = arith.constant 0.000000e+00 : f32
    %27 = vector.broadcast %19 : f32 to vector<1x8x128xf32>
    %28 = vector.broadcast %cst_8 : f32 to vector<1x8x128xf32>
    %29 = arith.select %26, %27, %28 : vector<1x8x128xi1>, vector<1x8x128xf32>
    %c0_9 = arith.constant 0 : index
    %c0_10 = arith.constant 0 : index
    %c0_11 = arith.constant 0 : index
    %30 = vector.load %arg3[%c0_9, %c0_10, %c0_11] : memref<1x8x128xf32, #tpu.memory_space<vmem>>, vector<1x8x128xf32>
    tpu.vector_store %arg3[%c0_9, %c0_10, %c0_11], %29 {strides = array<i32>} : memref<1x8x128xf32, #tpu.memory_space<vmem>>, vector<1x8x128xf32>,
    return
  }
  func.func @transform_0(%arg0: i32) -> (i32, i32) {
    %c0_i32 = arith.constant 0 : i32
    %c0_i32_0 = arith.constant 0 : i32
    return %c0_i32, %arg0 : i32, i32
  }
  func.func @transform_1(%arg0: i32) -> (i32, i32) {
    %c0_i32 = arith.constant 0 : i32
    %c0_i32_0 = arith.constant 0 : i32
    return %c0_i32, %arg0 : i32, i32
  }
  func.func @transform_2(%arg0: i32) -> (i32, i32, i32) {
    %c0_i32 = arith.constant 0 : i32
    %c0_i32_0 = arith.constant 0 : i32
    %c0_i32_1 = arith.constant 0 : i32
    return %arg0, %c0_i32, %c0_i32_0 : i32, i32, i32
  }
}

</mosaic_0001>

<bundles_post_ra>
// kernel: squeeze.3
= control target key start
LH: loop header
LB: loop body
LE: loop exit
PB: predicated region body
PF: predicated region fallthrough
CT: control target
= control target key end

     0   :  { %s72_s0 = inlined_call_operand.vmem [shape: f32[2,3,256], index: 0, kind: input, shape index: {}]   ;;  %s73_s1 = inlined_call_operand.vmem [shape: f32[1536], index: 1, kind: output, shape index: {}]  }
   0x1   :  { %v32_v0 = vld [vmem:[%s72_s0 + $0xc] sm:$0xf]  ;;  %v33_v1 = vld [vmem:[%s72_s0 + $0x8] sm:$0xf]  ;;  %v34_v2 = vld [vmem:[%s72_s0 + $0x4] sm:$0xf] }
   0x2   :  { %7 = vst [vmem:[#allocation0 + $0x8] sm:$0xf] %v32_v0  ;;  %v16_v3 = vld [vmem:[%s72_s0] sm:$0xf] }
   0x3   :  { %11 = vst [vmem:[#allocation0 + $0x18] sm:$0xf] %v33_v1 }
   0x4   :  { %15 = vst [vmem:[#allocation0] sm:$0xf] %v34_v2 }
   0x5   :  { %17 = vst [vmem:[#allocation0 + $0x10] sm:$0xf] %v16_v3 }
   0x9   :  { %v29_v4 = vld [vmem:[#allocation0 + $0x8] sm:$0x7]  }
   0xa   :  { %v25_v5 = vld [vmem:[#allocation0 + $0x18] sm:$0x7]   ;;  %37 = vst [vmem:[%s73_s1 + $0x7] ss:$2 sm:$0x7] %v29_v4  }
   0xb   :  { %v21_v6 = vld [vmem:[#allocation0] sm:$0x7]   ;;  %36 = vst [vmem:[%s73_s1 + $0x6] ss:$2 sm:$0x7] %v25_v5  }
   0xc   :  { %v18_v7 = vld [vmem:[#allocation0 + $0x10] sm:$0x7]   ;;  %35 = vst [vmem:[%s73_s1 + $0x1] ss:$2 sm:$0x7] %v21_v6  }
   0xd   :  { %19 = vst [vmem:[%s73_s1] ss:$2 sm:$0x7] %v18_v7  }

// kernel: squeeze.2
= control target key start
LH: loop header
LB: loop body
LE: loop exit
PB: predicated region body
PF: predicated region fallthrough
CT: control target
= control target key end

     0   :  { %vm12_vm0 = vcmask 523264   ;;  %s33_s10 = smov 64   ;;  %vm23_vm1 = vcmask 1048064   ;;  %s53_s0 = inlined_call_operand.vmem [shape: f32[2,3,64], index: 0, kind: input, shape index: {}]   ;;  %s54_s1 = inlined_call_operand.vmem [shape: f32[384], index: 1, kind: output, shape index: {}]  }
   0x1   :  { %v31_v0 = vld [vmem:[%s53_s0 + $0x4] sm:$0xf]  ;;  %v8_v1 = vld [vmem:[%s53_s0] sm:$0xf]  ;;  %s10_s0 = smov 3 }
   0x2   :  { %7 = vst [vmem:[#allocation1 + $0x8] sm:$0xf] %v31_v0 }
   0x3   :  { %9 = vst [vmem:[#allocation1] sm:$0xf] %v8_v1 }
   0x9   :  { %v15_v2 = vld [vmem:[#allocation1 + $0x9] sm:$0x1]  }
   0xa   :  { %v20_v3 = vld.sshfl [vmem:[#allocation1 + $0x1] sm:$0xff pattern:$0x99999970]   ;;  %18 = vst.msk [vmem:[#allocation0 + $0x2] sm:$0x1] %vm12_vm0, %v15_v2  }
   0xb   :  { %v11_v4 = vld [vmem:[#allocation1] ss:$2 sm:%s10_s0]   ;;  %21 = vrot.lane.b32.xlu0 %v20_v3, %s33_s10 }
   0xc   :  { %13 = vst.msk [vmem:[#allocation0] sm:$0x3] %vm12_vm0, %v11_v4  }
  0x7d   :  { %v22_v5 = vpop.permute.xlu0 %21  }
  0x7e   :  { %24 = vst.msk [vmem:[#allocation0] sm:$0x7] %vm23_vm1, %v22_v5  }
  0x85   :  { %v27_v6 = vld [vmem:[#allocation0] sm:$0xf] }
  0x86   :  { %30 = vst [vmem:[%s54_s1] sm:$0xf] %v27_v6 }

// kernel: _dense_conf_loss.1
= control target key start
LH: loop header
LB: loop body
LE: loop exit
PB: predicated region body
PF: predicated region fallthrough
CT: control target
= control target key end

     0   :  { %v51_v38 = vlaneseq  ;;  %s111_s0 = inlined_call_operand.vmem [shape: f32[8,256], index: 0, kind: input, shape index: {}]   ;;  %s112_s1 = inlined_call_operand.vmem [shape: f32[16,256], index: 1, kind: input, shape index: {}]   ;;  %s113_s2 = inlined_call_operand.vmem [shape: f32[1,8,128], index: 2, kind: output, shape index: {}]  }
   0x1   :  { %v11_v0 = vld [vmem:[%s111_s0] sm:$0xff]  ;;  %v12_v1 = vld [vmem:[%s111_s0 + $0x8] sm:$0xff]  ;;  %v15_v14 = vld [vmem:[%s112_s1 + $0x10] sm:$0xff] }
   0x2   :  { %v19_v2 = vand.u32 2147483647, %v11_v0  ;;  %v20_v3 = vand.u32 2147483647, %v12_v1  ;;  %v17_v12 = vmax.f32 %v11_v0, 0.0  ;;  %v18_v15 = vmax.f32 %v12_v1, 0.0 }
   0x3   :  { %v16_v17 = vld [vmem:[%s112_s1 + $0x18] sm:$0xff]  ;;  %v13_v19 = vld [vmem:[%s112_s1] sm:$0xff]  ;;  %v14_v21 = vld [vmem:[%s112_s1 + $0x8] sm:$0xff]  ;;  %v37_v23 = vmul.f32 %v15_v14, %v11_v0  ;;  %v52_v39 = vshrl.u32 %v51_v38, 7  ;;  %v54_v40 = vand.u32 127, %v51_v38 }
   0x4   :  { %v21_v4 = vsub.f32 0.0, %v19_v2  ;;  %v22_v5 = vsub.f32 0.0, %v20_v3  ;;  %v38_v25 = vmul.f32 %v16_v17, %v12_v1 }
   0x5   :  { %vm55_vm0 = vcmp.eq.s32.totalorder %v52_v39, 0  ;;  %vm56_vm1 = vcmp.eq.s32.totalorder %v54_v40, 0 }
   0x6   :  { %v23_v6 = vmul.f32 1.442695, %v21_v4  ;;  %v25_v7 = vmul.f32 1.442695, %v22_v5  ;;  %vm57_vm2 = vmand %vm55_vm0, %vm56_vm1 }
   0x8   :  { %67 = vpow2.f32 %v23_v6 }
   0x9   :  { %69 = vpow2.f32 %v25_v7 }
   0xe   :  { %v68_v8 = vpop.eup %67 }
   0xf   :  { %v70_v9 = vpop.eup %69  ;;  %v27_v10 = vadd.f32 1.0, %v68_v8 }
  0x10   :  { %v28_v11 = vadd.f32 1.0, %v70_v9 }
  0x11   :  { %71 = vlog2.f32 %v27_v10 }
  0x12   :  { %73 = vlog2.f32 %v28_v11 }
  0x17   :  { %v72_v13 = vpop.eup %71 }
  0x18   :  { %v74_v16 = vpop.eup %73  ;;  %v30_v18 = vmul.f32 0.6931472, %v72_v13 }
  0x19   :  { %v32_v20 = vmul.f32 0.6931472, %v74_v16 }
  0x1a   :  { %v33_v22 = vadd.f32 %v30_v18, %v17_v12 }
  0x1b   :  { %v34_v24 = vadd.f32 %v32_v20, %v18_v15 }
  0x1c   :  { %v35_v26 = vmul.f32 %v33_v22, %v13_v19 }
  0x1d   :  { %v36_v27 = vmul.f32 %v34_v24, %v14_v21 }
  0x1e   :  { %v39_v28 = vsub.f32 %v35_v26, %v37_v23 }
  0x1f   :  { %v40_v29 = vsub.f32 %v36_v27, %v38_v25 }
  0x21   :  { %v41_v30 = vadd.f32 %v40_v29, %v39_v28 }
  0x23   :  { %42 = vadd.xlane.f32.xlu0 %v41_v30 }
  0x96   :  { %v43_v31 = vpop.xlane.xlu0 %42 }
  0x97   :  { %v44_v32 = vrot.slane %v43_v31, 4 }
  0x99   :  { %v45_v33 = vadd.f32 %v44_v32, %v43_v31 }
  0x9b   :  { %v46_v34 = vrot.slane %v45_v33, 2 }
  0x9d   :  { %v47_v35 = vadd.f32 %v46_v34, %v45_v33 }
  0x9f   :  { %v48_v36 = vrot.slane %v47_v35, 1 }
  0xa1   :  { %v49_v37 = vadd.f32 %v48_v36, %v47_v35 }
  0xa3   :  { %65 = vpush %v49_v37 }
  0xd4   :  { %s66_s1 = spop %65 }
  0xd5   :  { %v58_v41 = vstv %s66_s1 }
  0xd6   :  { %v59_v42 = vsel %vm57_vm2, %v58_v41, 0.0 }
  0xd7   :  { %60 = vst [vmem:[%s113_s2] sm:$0xff] %v59_v42 }

</bundles_post_ra>
